<compile_context>
chip_gen: v7x
topology: tpu7x:2x2x1
jax: 0.10.0
libtpu: 0.0.40
codegen_flags: <defaults>
</compile_context>

<pallas_src>
import jax
import jax.numpy as jnp
from jax.experimental import pallas as pl
from jax.experimental.pallas import tpu as pltpu


LANE = 6 * 128          # 768: one slab row = 128 flattened (2,3) samples
TB_ROWS = 2048          # 2048 * 768 * 4B = 6 MiB per buffer (review: v6e/v7x)
MIN_GRID_STEPS = 4      # keep >=2 (prefer 4-8) grid steps so v7x can use both TCs


def _sample_kernel(param_ref, x_ref, o_ref):
    # param_ref block: (1, LANE)  -- resident in VMEM, broadcasts along sublanes.
    # x_ref / o_ref block: (tb, LANE) -- pure VPU elementwise multiply.
    o_ref[...] = x_ref[...] * param_ref[...]


def _pick_row_tile(rows: int) -> int:
    """Row-tile size: multiple of 8 (or full), capped at TB_ROWS, >=2 grid steps
    whenever rows >= 16 so the parallel grid axis can shard across TCs."""
    if rows < 16:
        return rows                                  # tiny input: one full block
    target = pl.cdiv(rows, MIN_GRID_STEPS)
    tb = max(8, (target // 8) * 8)                   # multiple of 8 (8,128 rule)
    return min(TB_ROWS, tb)


def sample_forward(param: jax.Array, x: jax.Array) -> jax.Array:
    """Pallas equivalent of Sample.forward: out = param * x (broadcast over batch)."""
    assert param.shape == (1, 2, 3)
    assert x.ndim == 3 and x.shape[1:] == (2, 3)
    B = x.shape[0]
    dtype = x.dtype

    # Lane-dense parameter row: 6 param values repeated 128x along lanes,
    # matching the flattened-sample layout of each slab row.
    # (Minor dtype nit from review: for non-f32 inputs this rounds the param
    #  before the multiply; inputs here are f32 so it is exact.)
    param_lane = jnp.tile(param.reshape(1, 6).astype(dtype), (1, LANE // 6))  # (1, 768)

    n = B * 6
    rows = pl.cdiv(n, LANE)
    padded = rows * LANE
    aligned = (padded == n)

    if aligned:
        # Pure bitcast: no extra HBM pass.
        x2d = x.reshape(rows, LANE)
    else:
        # Ragged batch: pad to a full slab (one extra HBM pass; see header note).
        x_flat = jnp.pad(x.reshape(n), (0, padded - n))
        x2d = x_flat.reshape(rows, LANE)

    tb = _pick_row_tile(rows)
    grid = (pl.cdiv(rows, tb),)

    out2d = pl.pallas_call(
        _sample_kernel,
        out_shape=jax.ShapeDtypeStruct((rows, LANE), dtype),
        grid_spec=pltpu.PrefetchScalarGridSpec(
            num_scalar_prefetch=0,
            grid=grid,
            in_specs=[
                # param: same (only) block every step -> stays resident in VMEM.
                pl.BlockSpec((1, LANE), lambda i: (0, 0)),
                # input: one coarse lane-dense slab tile per step.
                pl.BlockSpec((tb, LANE), lambda i: (i, 0)),
            ],
            out_specs=pl.BlockSpec((tb, LANE), lambda i: (i, 0)),
        ),
        compiler_params=pltpu.CompilerParams(
            dimension_semantics=("parallel",),
            vmem_limit_bytes=32 * 1024 * 1024,
        ),
    )(param_lane, x2d)

    if aligned:
        # Pure bitcast back to (B, 2, 3): no de-pad slice pass.
        return out2d.reshape(B, 2, 3)
    # Ragged batch: drop padding, restore (B, 2, 3).
    return out2d.reshape(padded)[:n].reshape(B, 2, 3)


if __name__ == "__main__":
    # Parameter init matching nn.Parameter(torch.ones(1, 2, 3)).
    param = jnp.ones((1, 2, 3), dtype=jnp.float32)

    # Small deterministic example input (ragged batch, single-block path).
    key = jax.random.PRNGKey(0)
    x = jax.random.normal(key, (4, 2, 3), dtype=jnp.float32)

    out = jax.block_until_ready(sample_forward(param, x))
    ref = param * x
    assert out.shape == x.shape and out.dtype == x.dtype
    assert jnp.allclose(out, ref, atol=0.0, rtol=0.0), "mismatch vs reference (ones param)"

    # Non-trivial param + ragged batch that exercises the padded path.
    param2 = jnp.arange(6, dtype=jnp.float32).reshape(1, 2, 3) * 0.5 - 1.0
    x2 = jax.random.normal(jax.random.PRNGKey(0), (257, 2, 3), dtype=jnp.float32)
    out2 = jax.block_until_ready(sample_forward(param2, x2))
    ref2 = param2 * x2
    assert jnp.allclose(out2, ref2, atol=1e-6, rtol=1e-6), "mismatch vs reference (ramp param)"

    # Aligned batch (B % 128 == 0): zero-copy bitcast path, multi-step grid.
    x3 = jax.random.normal(jax.random.PRNGKey(0), (2048, 2, 3), dtype=jnp.float32)
    out3 = jax.block_until_ready(sample_forward(param2, x3))
    ref3 = param2 * x3
    assert jnp.allclose(out3, ref3, atol=1e-6, rtol=1e-6), "mismatch vs reference (aligned batch)"

    print("KERNEL_OK")
</pallas_src>

<mosaic_0001>
module attributes {stable_mosaic.version = 11 : i64} {
  func.func @_sample_kernel(%arg0: i32, %arg1: memref<1x768xf32, #tpu.memory_space<vmem>>, %arg2: memref<1x768xf32, #tpu.memory_space<vmem>>, %arg3: memref<1x768xf32, #tpu.memory_space<vmem>>) attributes {dimension_semantics = [#tpu.dimension_semantics<parallel>], iteration_bounds = array<i64: 1>, scalar_prefetch = 0 : i64, scratch_operands = 0 : i64, tpu.core_type = #tpu.core_type<tc>, window_params = [{pipeline_mode = #tpu.pipeline_mode<synchronous>, transform_indices = @transform_0, window_bounds = array<i64: 1, 768>}, {transform_indices = @transform_1, window_bounds = array<i64: 1, 768>}, {transform_indices = @transform_2, window_bounds = array<i64: 1, 768>}]} {
    %c0 = arith.constant 0 : index
    %c0_0 = arith.constant 0 : index
    %0 = vector.load %arg2[%c0, %c0_0] : memref<1x768xf32, #tpu.memory_space<vmem>>, vector<1x768xf32>
    %c0_1 = arith.constant 0 : index
    %c0_2 = arith.constant 0 : index
    %1 = vector.load %arg1[%c0_1, %c0_2] : memref<1x768xf32, #tpu.memory_space<vmem>>, vector<1x768xf32>
    %2 = arith.mulf %0, %1 : vector<1x768xf32>
    %c0_3 = arith.constant 0 : index
    %c0_4 = arith.constant 0 : index
    %3 = vector.load %arg3[%c0_3, %c0_4] : memref<1x768xf32, #tpu.memory_space<vmem>>, vector<1x768xf32>
    tpu.vector_store %arg3[%c0_3, %c0_4], %2 {strides = array<i32>} : memref<1x768xf32, #tpu.memory_space<vmem>>, vector<1x768xf32>,
    return
  }
  func.func @transform_0(%arg0: i32) -> (i32, i32) {
    %c0_i32 = arith.constant 0 : i32
    %c0_i32_0 = arith.constant 0 : i32
    %c0_i32_1 = arith.constant 0 : i32
    return %c0_i32, %c0_i32_0 : i32, i32
  }
  func.func @transform_1(%arg0: i32) -> (i32, i32) {
    %c0_i32 = arith.constant 0 : i32
    %c0_i32_0 = arith.constant 0 : i32
    return %arg0, %c0_i32 : i32, i32
  }
  func.func @transform_2(%arg0: i32) -> (i32, i32) {
    %c0_i32 = arith.constant 0 : i32
    %c0_i32_0 = arith.constant 0 : i32
    return %arg0, %c0_i32 : i32, i32
  }
}

</mosaic_0001>

<bundles_post_ra>
// kernel: tpu_custom_call.1
= control target key start
LH: loop header
LB: loop body
LE: loop exit
PB: predicated region body
PF: predicated region fallthrough
CT: control target
= control target key end

     0   :  { %7 = vsyncpa [#allocation3], 0  ;;  %s189_s0 = inlined_call_operand.hbm [shape: f32[1,768], index: 0, kind: input, shape index: {}]   ;;  %s190_s1 = inlined_call_operand.hbm [shape: f32[1,768], index: 1, kind: input, shape index: {}]   ;;  %s191_s2 = inlined_call_operand.hbm [shape: f32[1,768], index: 2, kind: output, shape index: {}]  }
   0x1   :  { %8 = vsyncpa [#allocation6], 0 }
   0x2   :  { %9 = vsyncpa [#allocation4], 0  ;;  %s135_s9 = smov [#allocation2]   ;;  %s136_s11 = smov [#allocation5]  }
   0x3   :  { %s16_s10 = sshll.u32 %s135_s9, 4  ;;  %s26_s12 = sshll.u32 %s136_s11, 4  ;;  %s17_s10 = int_to_ptr.vmem [resolvable:$true] %s16_s10  ;;  %s27_s12 = int_to_ptr.vmem [resolvable:$true] %s26_s12 }
   0x4   :  { %s63_s15 = scalar_lea.hbm %s189_s0, 96 }
   0x5   :  { %p64_p0 = scmp.ne.s32.totalorder %s189_s0, %s63_s15  ;;  %p67_p1 = scmp.lt.u32.totalorder %s63_s15, %s189_s0 }
   0x7   :  { %p69_p2 = pnand %p67_p1, %p64_p0 }
   0x9   :  { %72 = shalt.err (!%p69_p2)
}
   0xa   :  { %s73_s20 = scalar_lea.vmem %s17_s10, 96  ;;  %p78_p4 = scmp.lt.s32.totalorder %s17_s10, %s17_s10 }
   0xb   :  { %p74_p3 = scmp.ne.s32.totalorder %s17_s10, %s73_s20  ;;  %p79_p5 = scmp.lt.s32.totalorder %s73_s20, %s73_s20 }
   0xd   :  { %p80_p6 = por %p79_p5, %p78_p4 }
   0xf   :  { %p81_p7 = pnand %p80_p6, %p74_p3 }
  0x11   :  { %84 = shalt.err (!%p81_p7)
}
  0x12   :  { %19 = dma.hbm_to_vmem [thread:$0]  %s189_s0, 96, %s17_s10, [#allocation3]  }
  0x13   :  { %s85_s25 = scalar_lea.hbm %s190_s1, 96 }
  0x14   :  { %p86_p8 = scmp.ne.s32.totalorder %s190_s1, %s85_s25  ;;  %p89_p9 = scmp.lt.u32.totalorder %s85_s25, %s190_s1 }
  0x16   :  { %p91_p10 = pnand %p89_p9, %p86_p8 }
  0x18   :  { %94 = shalt.err (!%p91_p10)
}
  0x19   :  { %s95_s30 = scalar_lea.vmem %s27_s12, 96  ;;  %p100_p12 = scmp.lt.s32.totalorder %s27_s12, %s27_s12 }
  0x1a   :  { %p96_p11 = scmp.ne.s32.totalorder %s27_s12, %s95_s30  ;;  %p101_p13 = scmp.lt.s32.totalorder %s95_s30, %s95_s30 }
  0x1c   :  { %p102_p0 = por %p101_p13, %p100_p12 }
  0x1e   :  { %p103_p1 = pnand %p102_p0, %p96_p11 }
  0x20   :  { %106 = shalt.err (!%p103_p1)
}
  0x21   :  { %29 = dma.hbm_to_vmem [thread:$0]  %s190_s1, 96, %s27_s12, [#allocation6]  }
  0x22   :  { %129 = dma.done.wait [#allocation3], 96  }
  0x23   :  { %130 = vsyncadd [#allocation3], 4294967200 }
  0x24   :  { %131 = dma.done.wait [#allocation6], 96  }
  0x25   :  { %132 = vsyncadd [#allocation6], 4294967200  ;;  %v39_v0 = vlaneseq  ;;  %s137_s4 = smov [#allocation7]   ;;  %v36_v1 = vld [vmem:[#allocation5] sm:$0x3f] }
  0x26   :  { %s50_s5 = sshll.u32 %s137_s4, 4  ;;  %v37_v2 = vld [vmem:[#allocation2] sm:$0x3f]  ;;  %s51_s5 = int_to_ptr.vmem [resolvable:$true] %s50_s5 }
  0x27   :  { %vm41_vm0 = vcmp.lt.s32.totalorder %v39_v0, 768  ;;  %v38_v3 = vmul.f32 %v37_v2, %v36_v1  ;;  %s107_s6 = scalar_lea.vmem %s51_s5, 96  ;;  %p112_p3 = scmp.lt.s32.totalorder %s51_s5, %s51_s5 }
  0x28   :  { %p108_p2 = scmp.ne.s32.totalorder %s51_s5, %s107_s6  ;;  %p113_p4 = scmp.lt.s32.totalorder %s107_s6, %s107_s6 }
  0x29   :  { %43 = vst.msk [vmem:[#allocation7] sm:$0x3f] %vm41_vm0, %v38_v3 }
  0x2a   :  { %p114_p5 = por %p113_p4, %p112_p3 }
  0x2c   :  { %p115_p6 = pnand %p114_p5, %p108_p2 }
  0x2e   :  { %118 = shalt.err (!%p115_p6)
}
  0x2f   :  { %s119_s8 = scalar_lea.hbm %s191_s2, 96 }
  0x30   :  { %p120_p7 = scmp.ne.s32.totalorder %s191_s2, %s119_s8  ;;  %p123_p8 = scmp.lt.u32.totalorder %s119_s8, %s191_s2 }
  0x32   :  { %p125_p9 = pnand %p123_p8, %p120_p7 }
  0x34   :  { %128 = shalt.err (!%p125_p9)
}
  0x35   :  { %53 = dma.vmem_to_hbm [thread:$0]  %s51_s5, 96, %s191_s2, [#allocation4]  }
  0x36   :  { %133 = dma.done.wait [#allocation4], 96  }
  0x37   :  { %134 = vsyncadd [#allocation4], 4294967200 }
  0x38   :  { %57 = vsyncpa [#allocation3], 1 }
  0x39   :  { %58 = vsyncpa [#allocation6], 1 }
  0x3a   :  { %59 = vsyncpa [#allocation4], 1 }

</bundles_post_ra>
